<compile_context>
chip_gen: v7x
topology: tpu7x:2x2x1
jax: 0.10.0
libtpu: 0.0.40
codegen_flags: <defaults>
</compile_context>

<pallas_src>
import functools

import jax
import jax.numpy as jnp
from jax.experimental import pallas as pl
from jax.experimental.pallas import tpu as pltpu

_EPS = 1e-7
_LANES = 128


def _ce_loss_kernel(y_true_ref, y_pred_ref, out_ref, *, n_valid, tile_n):
    """One grid step: soft-label CE over a (tile_n, C) slab of samples."""
    pid = pl.program_id(0)

    # DMA'd in native dtype; all math is f32 in VMEM/vregs.
    logits = y_pred_ref[...].astype(jnp.float32)          # (tile_n, C)
    targets = y_true_ref[...].astype(jnp.float32)         # (tile_n, C)
    targets = jnp.clip(targets, _EPS, 1.0 - _EPS)         # torch.clamp(y_true, ...)

    # Numerically-stable softmax over the class (lane) axis, then log(p + eps)
    # exactly as the PyTorch module does (NOT log_softmax: the +eps matters).
    m = jnp.max(logits, axis=-1, keepdims=True)
    e = jnp.exp(logits - m)
    p = e / jnp.sum(e, axis=-1, keepdims=True)
    loss = -targets * jnp.log(p + _EPS)                   # (tile_n, C)

    # Zero the padded rows of the last (partial) tile.
    row = jax.lax.broadcasted_iota(jnp.int32, loss.shape, 0) + pid * tile_n
    loss = jnp.where(row < n_valid, loss, 0.0)

    # Per-tile partial sum, replicated across a full lane-dense row.
    partial = jnp.sum(loss)
    out_ref[...] = jnp.full(out_ref.shape, partial, dtype=jnp.float32)


def _choose_tile_n(n_padded8, c, bytes_per_row_elem):
    """Pick TILE_N from the device VMEM budget (works on v5e/v6e/v7x)."""
    try:
        vmem_cap = pltpu.get_tpu_info().vmem_capacity_bytes
    except Exception:  # pragma: no cover - conservative fallback (v7x per-TC)
        vmem_cap = 64 * 1024 * 1024
    # Double-buffered y_true + y_pred streams should use <= ~1/4 of VMEM so the
    # f32 softmax temporaries still fit comfortably on every generation.
    budget = vmem_cap // 4
    per_row = 2 * c * bytes_per_row_elem          # 2 pipeline buffers per stream
    tile = budget // max(per_row, 1)
    tile = int(max(8, min(tile, 1024, n_padded8)))
    tile = max((tile // 8) * 8, 8)
    return tile, vmem_cap


def ce_loss(y_true, y_pred):
    """y_true: (N, C) soft labels; y_pred: (N, C) logits (any float dtype)."""
    assert y_true.shape == y_pred.shape and y_pred.ndim == 2
    n, c = y_pred.shape

    itemsizes = y_true.dtype.itemsize + y_pred.dtype.itemsize
    n8 = max(8, int(pl.cdiv(n, 8)) * 8)
    tile_n, vmem_cap = _choose_tile_n(n8, c, itemsizes)
    tile_n = min(tile_n, n8)
    n_pad = int(pl.cdiv(n, tile_n)) * tile_n
    num_tiles = n_pad // tile_n

    if n_pad != n:
        pad = ((0, n_pad - n), (0, 0))
        y_true = jnp.pad(y_true, pad)
        y_pred = jnp.pad(y_pred, pad)

    bytes_per_step = 2 * tile_n * c * itemsizes   # double-buffered input slabs
    vmem_limit = int(min(int(vmem_cap * 0.9),
                         max(32 * 1024 * 1024, 4 * bytes_per_step)))

    kernel = functools.partial(_ce_loss_kernel, n_valid=n, tile_n=tile_n)

    partials = pl.pallas_call(
        kernel,
        grid=(num_tiles,),
        in_specs=[
            pl.BlockSpec((tile_n, c), lambda i: (i, 0)),   # y_true slab
            pl.BlockSpec((tile_n, c), lambda i: (i, 0)),   # y_pred slab
        ],
        out_specs=pl.BlockSpec((1, 1, _LANES), lambda i: (i, 0, 0)),
        out_shape=jax.ShapeDtypeStruct((num_tiles, 1, _LANES), jnp.float32),
        compiler_params=pltpu.CompilerParams(
            dimension_semantics=("parallel",),
            vmem_limit_bytes=vmem_limit,
        ),
    )(y_true, y_pred)

    # Lane-dense per-tile partials (each tile's sum replicated on 128 lanes);
    # reduce in the wrapper so megacore can shard tiles across TensorCores.
    return jnp.sum(partials[:, 0, 0]) / n


def _reference(y_true, y_pred):
    """Pure-JAX replica of the PyTorch CE_loss forward."""
    t = jnp.clip(y_true.astype(jnp.float32), _EPS, 1.0 - _EPS)
    p = jax.nn.softmax(y_pred.astype(jnp.float32), axis=-1)
    loss = -t * jnp.log(p + _EPS)
    return jnp.mean(jnp.sum(loss, axis=-1))


if __name__ == "__main__":
    N, C = 16, 32

    key = jax.random.PRNGKey(0)
    k_true, k_pred = jax.random.split(key)

    # Soft targets (a probability distribution per sample) and bf16 logits
    # (kernel DMAs the native dtype and upcasts in VMEM).
    y_true = jax.nn.softmax(jax.random.normal(k_true, (N, C), dtype=jnp.float32), axis=-1)
    y_pred = jax.random.normal(k_pred, (N, C), dtype=jnp.float32).astype(jnp.bfloat16)

    loss = jax.block_until_ready(ce_loss(y_true, y_pred))
    ref = jax.block_until_ready(_reference(y_true, y_pred))
    assert jnp.allclose(loss, ref, rtol=1e-5, atol=1e-5), (loss, ref)

    print("KERNEL_OK")
</pallas_src>

<mosaic_0001>
module attributes {stable_mosaic.version = 11 : i64} {
  func.func @_ce_loss_kernel(%arg0: i32, %arg1: memref<16x32xf32, #tpu.memory_space<vmem>>, %arg2: memref<16x32xbf16, #tpu.memory_space<vmem>>, %arg3: memref<1x1x128xf32, #tpu.memory_space<vmem>>) attributes {dimension_semantics = [#tpu.dimension_semantics<parallel>], iteration_bounds = array<i64: 1>, scalar_prefetch = 0 : i64, scratch_operands = 0 : i64, tpu.core_type = #tpu.core_type<tc>, window_params = [{transform_indices = @transform_0, window_bounds = array<i64: 16, 32>}, {transform_indices = @transform_1, window_bounds = array<i64: 16, 32>}, {transform_indices = @transform_2, window_bounds = array<i64: 1, 1, 128>}]} {
    %c0 = arith.constant 0 : index
    %c0_0 = arith.constant 0 : index
    %0 = vector.load %arg2[%c0, %c0_0] : memref<16x32xbf16, #tpu.memory_space<vmem>>, vector<16x32xbf16>
    %1 = arith.extf %0 : vector<16x32xbf16> to vector<16x32xf32>
    %c0_1 = arith.constant 0 : index
    %c0_2 = arith.constant 0 : index
    %2 = vector.load %arg1[%c0_1, %c0_2] : memref<16x32xf32, #tpu.memory_space<vmem>>, vector<16x32xf32>
    %cst = arith.constant 1.000000e-07 : f32
    %cst_3 = arith.constant 0.99999988 : f32
    %3 = vector.broadcast %cst : f32 to vector<16x32xf32>
    %4 = arith.maximumf %3, %2 : vector<16x32xf32>
    %5 = vector.broadcast %cst_3 : f32 to vector<16x32xf32>
    %6 = arith.minimumf %5, %4 : vector<16x32xf32>
    %cst_4 = arith.constant dense<0xFF800000> : vector<16xf32>
    %7 = vector.multi_reduction <maximumf>, %1, %cst_4 [1] : vector<16x32xf32> to vector<16xf32>
    %8 = vector.shape_cast %7 : vector<16xf32> to vector<16x1xf32>
    %9 = vector.broadcast %8 : vector<16x1xf32> to vector<16x32xf32>
    %10 = arith.subf %1, %9 : vector<16x32xf32>
    %11 = math.exp %10 : vector<16x32xf32>
    %cst_5 = arith.constant dense<0.000000e+00> : vector<16xf32>
    %12 = vector.multi_reduction <add>, %11, %cst_5 [1] : vector<16x32xf32> to vector<16xf32>
    %13 = vector.shape_cast %12 : vector<16xf32> to vector<16x1xf32>
    %14 = vector.broadcast %13 : vector<16x1xf32> to vector<16x32xf32>
    %15 = arith.divf %11, %14 : vector<16x32xf32>
    %cst_6 = arith.constant 0.000000e+00 : f32
    %16 = vector.broadcast %cst_6 : f32 to vector<16x32xf32>
    %17 = arith.subf %16, %6 : vector<16x32xf32>
    %cst_7 = arith.constant 1.000000e-07 : f32
    %18 = vector.broadcast %cst_7 : f32 to vector<16x32xf32>
    %19 = arith.addf %15, %18 : vector<16x32xf32>
    %20 = math.log %19 : vector<16x32xf32>
    %21 = arith.mulf %17, %20 : vector<16x32xf32>
    %22 = tpu.iota {dimensions = array<i32: 0>} : vector<16x32xi32>
    %c16_i32 = arith.constant 16 : i32
    %23 = arith.muli %arg0, %c16_i32 : i32
    %24 = vector.broadcast %23 : i32 to vector<16x32xi32>
    %25 = arith.addi %22, %24 : vector<16x32xi32>
    %c16_i32_8 = arith.constant 16 : i32
    %26 = vector.broadcast %c16_i32_8 : i32 to vector<16x32xi32>
    %27 = arith.cmpi slt, %25, %26 : vector<16x32xi32>
    %cst_9 = arith.constant 0.000000e+00 : f32
    %28 = vector.broadcast %cst_9 : f32 to vector<16x32xf32>
    %29 = arith.select %27, %21, %28 : vector<16x32xi1>, vector<16x32xf32>
    %30 = vector.shape_cast %29 : vector<16x32xf32> to vector<1x16x32xf32>
    %cst_10 = arith.constant dense<0.000000e+00> : vector<1xf32>
    %31 = vector.multi_reduction <add>, %30, %cst_10 [1, 2] : vector<1x16x32xf32> to vector<1xf32>
    %32 = vector.shape_cast %31 : vector<1xf32> to vector<1x1x1xf32>
    %33 = vector.extract %32[0, 0, 0] : f32 from vector<1x1x1xf32>
    %34 = vector.broadcast %33 : f32 to vector<1x1x128xf32>
    %c0_11 = arith.constant 0 : index
    %c0_12 = arith.constant 0 : index
    %c0_13 = arith.constant 0 : index
    %35 = vector.load %arg3[%c0_11, %c0_12, %c0_13] : memref<1x1x128xf32, #tpu.memory_space<vmem>>, vector<1x1x128xf32>
    tpu.vector_store %arg3[%c0_11, %c0_12, %c0_13], %34 {strides = array<i32>} : memref<1x1x128xf32, #tpu.memory_space<vmem>>, vector<1x1x128xf32>,
    return
  }
  func.func @transform_0(%arg0: i32) -> (i32, i32) {
    %c0_i32 = arith.constant 0 : i32
    %c0_i32_0 = arith.constant 0 : i32
    return %arg0, %c0_i32 : i32, i32
  }
  func.func @transform_1(%arg0: i32) -> (i32, i32) {
    %c0_i32 = arith.constant 0 : i32
    %c0_i32_0 = arith.constant 0 : i32
    return %arg0, %c0_i32 : i32, i32
  }
  func.func @transform_2(%arg0: i32) -> (i32, i32, i32) {
    %c0_i32 = arith.constant 0 : i32
    %c0_i32_0 = arith.constant 0 : i32
    %c0_i32_1 = arith.constant 0 : i32
    return %arg0, %c0_i32, %c0_i32_0 : i32, i32, i32
  }
}

</mosaic_0001>

<bundles_post_ra>
// kernel: tpu_custom_call.1
= control target key start
LH: loop header
LB: loop body
LE: loop exit
PB: predicated region body
PF: predicated region fallthrough
CT: control target
= control target key end

     0   :  { %7 = vsyncpa [#allocation3], 0  ;;  %s285_s0 = inlined_call_operand.hbm [shape: f32[16,32], index: 0, kind: input, shape index: {}]   ;;  %s286_s1 = inlined_call_operand.hbm [shape: bf16[16,32], index: 1, kind: input, shape index: {}]   ;;  %s287_s2 = inlined_call_operand.hbm [shape: f32[1,1,128], index: 2, kind: output, shape index: {}]  }
   0x1   :  { %8 = vsyncpa [#allocation6], 0 }
   0x2   :  { %9 = vsyncpa [#allocation4], 0  ;;  %s221_s9 = smov [#allocation2]   ;;  %s149_s13 = scalar_lea.hbm %s285_s0, 256 }
   0x3   :  { %s15_s10 = sshll.u32 %s221_s9, 4  ;;  %p150_p0 = scmp.ne.s32.totalorder %s285_s0, %s149_s13  ;;  %s16_s10 = int_to_ptr.vmem [resolvable:$true] %s15_s10 }
   0x4   :  { %p153_p1 = scmp.lt.u32.totalorder %s149_s13, %s285_s0 }
   0x6   :  { %p155_p2 = pnand %p153_p1, %p150_p0 }
   0x8   :  { %158 = shalt.err (!%p155_p2)
}
   0x9   :  { %s159_s18 = scalar_lea.vmem %s16_s10, 256  ;;  %p164_p4 = scmp.lt.s32.totalorder %s16_s10, %s16_s10 }
   0xa   :  { %p160_p3 = scmp.ne.s32.totalorder %s16_s10, %s159_s18  ;;  %p165_p5 = scmp.lt.s32.totalorder %s159_s18, %s159_s18 }
   0xc   :  { %p166_p6 = por %p165_p5, %p164_p4 }
   0xe   :  { %p167_p7 = pnand %p166_p6, %p160_p3 }
  0x10   :  { %170 = shalt.err (!%p167_p7)
}
  0x11   :  { %s222_s19 = smov 128   ;;  %s223_s20 = smov 8  }
  0x12   :  { %21 = dma.hbm_to_vmem [thread:$0]  %s285_s0, 256, %s16_s10, [#allocation3], %s222_s19, %s222_s19, %s223_s20  }
  0x13   :  { %s224_s23 = smov [#allocation5]   ;;  %s171_s27 = scalar_lea.hbm %s286_s1, 128 }
  0x14   :  { %s27_s24 = sshll.u32 %s224_s23, 4  ;;  %p172_p8 = scmp.ne.s32.totalorder %s286_s1, %s171_s27  ;;  %s28_s24 = int_to_ptr.vmem [resolvable:$true] %s27_s24 }
  0x15   :  { %p175_p9 = scmp.lt.u32.totalorder %s171_s27, %s286_s1 }
  0x17   :  { %p177_p10 = pnand %p175_p9, %p172_p8 }
  0x19   :  { %180 = shalt.err (!%p177_p10)
}
  0x1a   :  { %s181_s4 = scalar_lea.vmem %s28_s24, 128  ;;  %p186_p12 = scmp.lt.s32.totalorder %s28_s24, %s28_s24 }
  0x1b   :  { %p182_p11 = scmp.ne.s32.totalorder %s28_s24, %s181_s4  ;;  %p187_p13 = scmp.lt.s32.totalorder %s181_s4, %s181_s4 }
  0x1d   :  { %p188_p0 = por %p187_p13, %p186_p12 }
  0x1f   :  { %p189_p1 = pnand %p188_p0, %p182_p11 }
  0x21   :  { %192 = shalt.err (!%p189_p1)
}
  0x22   :  { %s225_s0 = smov 64   ;;  %s226_s5 = smov 4  }
  0x23   :  { %33 = dma.hbm_to_vmem [thread:$0]  %s286_s1, 128, %s28_s24, [#allocation6], %s225_s0, %s225_s0, %s226_s5  }
  0x24   :  { %215 = dma.done.wait [#allocation3], 256  }
  0x25   :  { %216 = vsyncadd [#allocation3], 4294967040 }
  0x26   :  { %217 = dma.done.wait [#allocation6], 128  }
  0x27   :  { %218 = vsyncadd [#allocation6], 4294967168  ;;  %v125_v0 = vld [vmem:[#allocation5] sm:$0xff]   ;;  %vm50_vm0 = vcmask 261120   ;;  %v44_v21 = vld [vmem:[#allocation2] sm:$0xff]  ;;  %s227_s1 = smov [#allocation7]  }
  0x28   :  { %v126_v1 = vunpack.c.l.bf16 %v125_v0  ;;  %v127_v2 = vunpack.c.h.bf16 %v125_v0  ;;  %v45_v23 = vld [vmem:[#allocation2 + $0x8] sm:$0xff]  ;;  %v46_v25 = vmax.f32 %v44_v21, 1e-07  ;;  %s114_s8 = sshll.u32 %s227_s1, 4  ;;  %s115_s8 = int_to_ptr.vmem [resolvable:$true] %s114_s8 }
  0x29   :  { %v47_v26 = vmax.f32 %v45_v23, 1e-07  ;;  %s193_s10 = scalar_lea.vmem %s115_s8, 16  ;;  %s197_s11 = scalar_lea.vmem %s115_s8, 32 }
  0x2a   :  { %v51_v3 = vsel %vm50_vm0, %v126_v1, -inf  ;;  %v54_v4 = vsel %vm50_vm0, %v127_v2, -inf  ;;  %v48_v27 = vmin.f32 %v46_v25, 0.9999999  ;;  %p194_p2 = scmp.ne.s32.totalorder %s115_s8, %s193_s10  ;;  %p198_p3 = scmp.lt.s32.totalorder %s115_s8, %s115_s8 }
  0x2b   :  { %52 = vmax.xlane.f32.xlu0 %v51_v3  ;;  %v49_v28 = vmin.f32 %v47_v26, 0.9999999  ;;  %p199_p4 = scmp.lt.s32.totalorder %s197_s11, %s193_s10 }
  0x2c   :  { %v73_v30 = vsub.f32 0.0, %v48_v27 }
  0x2d   :  { %v74_v32 = vsub.f32 0.0, %v49_v28  ;;  %p200_p5 = por %p199_p4, %p198_p3 }
  0x2f   :  { %55 = vmax.xlane.f32.xlu0 %v54_v4  ;;  %p201_p6 = pnand %p200_p5, %p194_p2 }
  0xb8   :  { %v53_v5 = vpop.xlane.xlu0 %52 }
  0xb9   :  { %v57_v6 = vsub.f32 %v126_v1, %v53_v5 }
  0xbb   :  { %v59_v7 = vmul.f32 1.442695, %v57_v6 }
  0xbc   :  { %v56_v8 = vpop.xlane.xlu0 %55 }
  0xbd   :  { %137 = vpow2.f32 %v59_v7  ;;  %v58_v9 = vsub.f32 %v127_v2, %v56_v8 }
  0xbf   :  { %v61_v10 = vmul.f32 1.442695, %v58_v9 }
  0xc1   :  { %139 = vpow2.f32 %v61_v10 }
  0xc7   :  { %v138_v11 = vpop.eup %137 }
  0xc8   :  { %v63_v12 = vsel %vm50_vm0, %v138_v11, 0.0 }
  0xc9   :  { %64 = vadd.xlane.f32.xlu1 %v63_v12 }
  0xcb   :  { %v140_v13 = vpop.eup %139 }
  0xcc   :  { %v66_v14 = vsel %vm50_vm0, %v140_v13, 0.0 }
  0xcd   :  { %67 = vadd.xlane.f32.xlu1 %v66_v14 }
 0x156   :  { %v65_v15 = vpop.xlane.xlu1 %64 }
 0x157   :  { %141 = vrcp.f32 %v65_v15 }
 0x15a   :  { %v68_v16 = vpop.xlane.xlu1 %67 }
 0x15b   :  { %143 = vrcp.f32 %v68_v16 }
 0x161   :  { %v142_v17 = vpop.eup %141 }
 0x162   :  { %v70_v18 = vmul.f32 %v142_v17, %v138_v11 }
 0x164   :  { %v75_v19 = vadd.f32 1e-07, %v70_v18 }
 0x165   :  { %v144_v20 = vpop.eup %143 }
 0x166   :  { %v72_v22 = vmul.f32 %v144_v20, %v140_v13  ;;  %145 = vlog2.f32 %v75_v19 }
 0x168   :  { %v76_v24 = vadd.f32 1e-07, %v72_v22 }
 0x16a   :  { %147 = vlog2.f32 %v76_v24 }
 0x170   :  { %v146_v29 = vpop.eup %145 }
 0x171   :  { %v78_v31 = vmul.f32 0.6931472, %v146_v29 }
 0x173   :  { %v81_v35 = vmul.f32 %v78_v31, %v73_v30 }
 0x174   :  { %v148_v33 = vpop.eup %147 }
 0x175   :  { %v80_v34 = vmul.f32 0.6931472, %v148_v33  ;;  %v94_v37 = vsel %vm50_vm0, %v81_v35, 0.0 }
 0x177   :  { %v82_v36 = vmul.f32 %v80_v34, %v74_v32 }
 0x179   :  { %v95_v38 = vsel %vm50_vm0, %v82_v36, 0.0 }
 0x17a   :  { %v96_v39 = vadd.f32 %v95_v38, %v94_v37 }
 0x17c   :  { %97 = vadd.xlane.f32.xlu0 %v96_v39 }
 0x209   :  { %v98_v40 = vpop.xlane.xlu0 %97 }
 0x20a   :  { %v99_v41 = vrot.slane %v98_v40, 4 }
 0x20c   :  { %v100_v42 = vadd.f32 %v99_v41, %v98_v40 }
 0x20e   :  { %v101_v43 = vrot.slane %v100_v42, 2 }
 0x210   :  { %v102_v44 = vadd.f32 %v101_v43, %v100_v42 }
 0x212   :  { %v103_v45 = vrot.slane %v102_v44, 1 }
 0x214   :  { %v104_v46 = vadd.f32 %v103_v45, %v102_v44 }
 0x216   :  { %128 = vpush %v104_v46 }
 0x247   :  { %s129_s9 = spop %128 }
 0x248   :  { %v106_v47 = vstv %s129_s9 }
 0x249   :  { %107 = vst [vmem:[#allocation7] sm:$0x1] %v106_v47 }
 0x24a   :  { %204 = shalt.err (!%p201_p6)
}
 0x24b   :  { %s205_s14 = scalar_lea.hbm %s287_s2, 16 }
 0x24c   :  { %p206_p7 = scmp.ne.s32.totalorder %s287_s2, %s205_s14  ;;  %p209_p8 = scmp.lt.u32.totalorder %s205_s14, %s287_s2 }
 0x24e   :  { %p211_p9 = pnand %p209_p8, %p206_p7 }
 0x250   :  { %214 = shalt.err (!%p211_p9)
}
 0x251   :  { %117 = dma.vmem_to_hbm [thread:$0]  %s115_s8, 16, %s287_s2, [#allocation4]  }
 0x252   :  { %219 = dma.done.wait [#allocation4], 16  }
 0x253   :  { %220 = vsyncadd [#allocation4], 4294967280 }
 0x254   :  { %121 = vsyncpa [#allocation3], 1 }
 0x255   :  { %122 = vsyncpa [#allocation6], 1 }
 0x256   :  { %123 = vsyncpa [#allocation4], 1 }

</bundles_post_ra>
